<compile_context>
chip_gen: v5e
topology: v5e:2x2
jax: 0.10.0
libtpu: 0.0.40
codegen_flags: <defaults>
</compile_context>

<pallas_src>
import functools
import math

import jax
import jax.numpy as jnp
from jax.experimental import pallas as pl
from jax.experimental.pallas import tpu as pltpu

_SQRT2_INV = 1.0 / math.sqrt(2.0)
_SQRT_2_OVER_PI = math.sqrt(2.0 / math.pi)


def _round_up(x, m):
    return ((x + m - 1) // m) * m


def _gelu_exact(h):
    # torch.nn.GELU() default: exact erf formulation (computed in f32).
    return 0.5 * h * (1.0 + jax.lax.erf(h * _SQRT2_INV))


def _gelu_tanh(h):
    # tanh approximation (routes through the otherwise-idle EUP slot).
    return 0.5 * h * (1.0 + jnp.tanh(_SQRT_2_OVER_PI * (h + 0.044715 * h * h * h)))


def _tpu_hw_info():
    """Return (vmem_capacity_bytes, tensorcores_per_chip) with safe fallbacks."""
    vmem_bytes = 64 << 20  # conservative: valid on every generation
    num_tc = 1
    try:
        info = pltpu.get_tpu_info()
        v = getattr(info, "vmem_capacity_bytes", None)
        if v:
            vmem_bytes = int(v)
        cores = getattr(info, "tensorcores_per_chip", None) or getattr(info, "num_cores", None)
        if cores:
            num_tc = int(cores)
        else:
            # Heuristic: 64 MiB-per-TC parts (v7x) have 2 TensorCores per chip.
            num_tc = 2 if vmem_bytes <= (64 << 20) else 1
    except Exception:  # hardware query unavailable -> conservative defaults
        pass
    return vmem_bytes, num_tc


# ---------------------------------------------------------------------------
# Kernels
# ---------------------------------------------------------------------------

def _ffn_kernel_resident(gelu, x_ref, w1_ref, b1_ref, w2_ref, b2_ref, o_ref):
    # Full hidden dim in one shot; weight index maps are grid-constant so the
    # weights are fetched from HBM exactly once and stay VMEM-resident.
    x = x_ref[...]
    h = jnp.dot(x, w1_ref[...], preferred_element_type=jnp.float32)
    h = gelu(h + b1_ref[...].astype(jnp.float32))
    # Dropout: identity (inference mode).
    y = jnp.dot(h.astype(x.dtype), w2_ref[...], preferred_element_type=jnp.float32)
    o_ref[...] = (y + b2_ref[...].astype(jnp.float32)).astype(o_ref.dtype)


def _ffn_kernel_ksplit_scratch(gelu, x_ref, w1_ref, b1_ref, w2_ref, b2_ref,
                               o_ref, acc_ref):
    # Hidden dim streamed in chunks along grid axis 1; f32 VMEM accumulator.
    k = pl.program_id(1)

    @pl.when(k == 0)
    def _():
        acc_ref[...] = jnp.zeros_like(acc_ref)

    x = x_ref[...]
    h = jnp.dot(x, w1_ref[...], preferred_element_type=jnp.float32)
    h = gelu(h + b1_ref[...].astype(jnp.float32))
    # Dropout: identity (inference mode).
    acc_ref[...] += jnp.dot(h.astype(x.dtype), w2_ref[...],
                            preferred_element_type=jnp.float32)

    @pl.when(k == pl.num_programs(1) - 1)
    def _():
        o_ref[...] = (acc_ref[...] + b2_ref[...].astype(jnp.float32)).astype(o_ref.dtype)


def _ffn_kernel_ksplit_inplace(gelu, x_ref, w1_ref, b1_ref, w2_ref, b2_ref, o_ref):
    # f32 output: accumulate directly in the output block (resident across k
    # because its index_map is constant in k) -- no extra scratch VMEM.
    k = pl.program_id(1)

    @pl.when(k == 0)
    def _():
        o_ref[...] = jnp.zeros_like(o_ref)

    x = x_ref[...]
    h = jnp.dot(x, w1_ref[...], preferred_element_type=jnp.float32)
    h = gelu(h + b1_ref[...].astype(jnp.float32))
    # Dropout: identity (inference mode).
    o_ref[...] += jnp.dot(h.astype(x.dtype), w2_ref[...],
                          preferred_element_type=jnp.float32)

    @pl.when(k == pl.num_programs(1) - 1)
    def _():
        o_ref[...] += b2_ref[...].astype(jnp.float32)


# ---------------------------------------------------------------------------
# Tile selection
# ---------------------------------------------------------------------------

def _largest_div_tile(hidden_p, cap):
    """Largest multiple-of-128 divisor of hidden_p that is <= cap."""
    n = hidden_p // 128
    cap_d = max(1, min(n, cap // 128))
    best = 1
    for d in range(1, cap_d + 1):
        if n % d == 0:
            best = d
    return best * 128


def _choose_tiles(tokens, feat_p, hidden_p, itemsize, tile_m, tile_k,
                  vmem_bytes, num_tc, inplace_acc_ok):
    sub = 16 if itemsize == 2 else 8                 # sublane granule
    budget = int(0.75 * vmem_bytes)                  # per-generation VMEM budget
    tokens_r = _round_up(max(int(tokens), 1), sub)

    if tile_m is None:
        tile_m = 1024 if itemsize == 2 else 512
        if num_tc >= 2 and tokens_r > sub:
            # >=2 row tiles so the "parallel" axis shards across both TCs (v7x).
            tile_m = min(tile_m, max(sub, _round_up((tokens_r + 1) // 2, sub)))
    tile_m = max(sub, _round_up(int(tile_m), sub))
    tile_m = min(tile_m, tokens_r)

    cap = hidden_p if tile_k is None else max(128, min(_round_up(int(tile_k), 128), hidden_p))
    tile_k = _largest_div_tile(hidden_p, cap)        # always a divisor of hidden_p

    tile_k_floor = _largest_div_tile(hidden_p, min(512, hidden_p))
    tile_m_floor = min(tokens_r, _round_up(256, sub))

    def footprint(tm, tk):
        dbl = 2  # Pallas double-buffers every pipelined operand
        n_k = hidden_p // tk
        xo_b = 2 * tm * feat_p * itemsize * dbl               # x tile + out tile
        w_b = 2 * feat_p * tk * itemsize * dbl                 # W1 + W2 tiles
        bias_b = (tk + feat_p) * itemsize * dbl
        acc_b = 0 if (n_k == 1 or inplace_acc_ok) else tm * feat_p * 4
        h_b = tm * tk * 4                                      # f32 intermediate
        return xo_b + w_b + bias_b + acc_b + h_b

    # Shrink priority: tile_k down to 512 (does not change weight HBM traffic),
    # then tile_m down to its floor (re-streams weights), then -- last resort --
    # tile_k down to 128, then tile_m down to the sublane granule.
    # Every step re-rounds to valid (sub,128) granularity.
    while footprint(tile_m, tile_k) > budget:
        if tile_k > tile_k_floor:
            tile_k = _largest_div_tile(hidden_p, max(tile_k_floor, tile_k - 128))
        elif tile_m > tile_m_floor:
            tile_m = max(tile_m_floor, _round_up(tile_m // 2, sub))
        elif tile_k > 128:
            tile_k = _largest_div_tile(hidden_p, tile_k - 128)
        elif tile_m > sub:
            tile_m = max(sub, _round_up(tile_m // 2, sub))
        else:
            break

    return tile_m, tile_k, footprint(tile_m, tile_k)


# ---------------------------------------------------------------------------
# Wrapper
# ---------------------------------------------------------------------------

def feed_forward_network(x, w1, b1, w2, b2, *, tile_m=None, tile_k=None,
                         compute_dtype=None, approximate_gelu=False):
    """y = GELU(x @ W1 + b1) @ W2 + b2 (dropout = identity / eval mode).

    x: [..., feat]; w1: [feat, hidden]; b1: [hidden]; w2: [hidden, feat]; b2: [feat].
    Weights are stored transposed relative to torch (in_features, out_features).
    """
    orig_shape = x.shape
    feat = int(orig_shape[-1])
    hidden = int(w1.shape[1])
    tokens = 1
    for d in orig_shape[:-1]:
        tokens *= int(d)

    out_dtype = x.dtype
    if compute_dtype is not None and jnp.dtype(compute_dtype) != jnp.dtype(x.dtype):
        # bf16 MXU path: cast once here; matmuls still accumulate in f32.
        x = x.astype(compute_dtype)
        w1 = w1.astype(compute_dtype)
        w2 = w2.astype(compute_dtype)
        b1 = b1.astype(compute_dtype)
        b2 = b2.astype(compute_dtype)
    cdtype = x.dtype
    itemsize = jnp.dtype(cdtype).itemsize

    # Lane-dense padding (zero padding is exact: padded weight rows/cols and
    # biases are zero, GELU(0)=0, padded outputs are sliced off).
    feat_p = _round_up(feat, 128)
    hidden_p = _round_up(hidden, 128)

    vmem_bytes, num_tc = _tpu_hw_info()
    inplace_acc_ok = jnp.dtype(out_dtype) == jnp.dtype(jnp.float32)
    tile_m, tile_k, fp = _choose_tiles(tokens, feat_p, hidden_p, itemsize,
                                       tile_m, tile_k, vmem_bytes, num_tc,
                                       inplace_acc_ok)
    tokens_p = _round_up(tokens, tile_m)
    n_rows = tokens_p // tile_m
    n_k = hidden_p // tile_k                 # tile_k always divides hidden_p

    # Pad only when needed (skips the HBM round-trip for aligned weights).
    x2d = x.reshape(tokens, feat)
    if (tokens_p, feat_p) != (tokens, feat):
        x2d = jnp.pad(x2d, ((0, tokens_p - tokens), (0, feat_p - feat)))
    w1_p = w1 if (feat_p, hidden_p) == (feat, hidden) else jnp.pad(
        w1, ((0, feat_p - feat), (0, hidden_p - hidden)))
    w2_p = w2 if (hidden_p, feat_p) == (hidden, feat) else jnp.pad(
        w2, ((0, hidden_p - hidden), (0, feat_p - feat)))
    b1_p = (b1 if hidden_p == hidden else jnp.pad(b1, (0, hidden_p - hidden))).reshape(1, hidden_p)
    b2_p = (b2 if feat_p == feat else jnp.pad(b2, (0, feat_p - feat))).reshape(1, feat_p)

    gelu = _gelu_tanh if approximate_gelu else _gelu_exact

    if n_k == 1:
        # Weight-resident fast path: 1-D grid over row tiles; weights fetched once.
        kernel = functools.partial(_ffn_kernel_resident, gelu)
        grid = (n_rows,)
        in_specs = [
            pl.BlockSpec((tile_m, feat_p), lambda i: (i, 0)),     # x row-tile
            pl.BlockSpec((feat_p, hidden_p), lambda i: (0, 0)),   # W1 (resident)
            pl.BlockSpec((1, hidden_p), lambda i: (0, 0)),        # b1 (resident)
            pl.BlockSpec((hidden_p, feat_p), lambda i: (0, 0)),   # W2 (resident)
            pl.BlockSpec((1, feat_p), lambda i: (0, 0)),          # b2 (resident)
        ]
        out_specs = pl.BlockSpec((tile_m, feat_p), lambda i: (i, 0))
        scratch_shapes = []
        dims = ("parallel",)
        weight_fetches = 1
    else:
        # k-split path: stream W1/W2 in hidden chunks, accumulate over k.
        if inplace_acc_ok:
            kernel = functools.partial(_ffn_kernel_ksplit_inplace, gelu)
            scratch_shapes = []
        else:
            kernel = functools.partial(_ffn_kernel_ksplit_scratch, gelu)
            scratch_shapes = [pltpu.VMEM((tile_m, feat_p), jnp.float32)]
        grid = (n_rows, n_k)
        in_specs = [
            pl.BlockSpec((tile_m, feat_p), lambda i, k: (i, 0)),  # x row-tile
            pl.BlockSpec((feat_p, tile_k), lambda i, k: (0, k)),  # W1 column-chunk
            pl.BlockSpec((1, tile_k), lambda i, k: (0, k)),       # b1 chunk
            pl.BlockSpec((tile_k, feat_p), lambda i, k: (k, 0)),  # W2 row-chunk
            pl.BlockSpec((1, feat_p), lambda i, k: (0, 0)),       # b2
        ]
        out_specs = pl.BlockSpec((tile_m, feat_p), lambda i, k: (i, 0))
        dims = ("parallel", "arbitrary")
        weight_fetches = n_rows          # weights re-streamed once per row tile

    weight_bytes = (w1_p.size + w2_p.size + b1_p.size + b2_p.size) * itemsize
    cost = pl.CostEstimate(
        flops=int(4 * tokens_p * feat_p * hidden_p),               # two matmuls
        transcendentals=int(tokens_p * hidden_p),                  # erf / tanh
        bytes_accessed=int((x2d.size + tokens_p * feat_p) * itemsize
                           + weight_bytes * weight_fetches),
    )

    # vmem_limit: footprint + margin, capped at ~85% of this generation's VMEM.
    vmem_limit = int(min(max(int(fp * 1.25) + (2 << 20), fp + (2 << 20), 32 << 20),
                         int(0.85 * vmem_bytes)))

    out2d = pl.pallas_call(
        kernel,
        out_shape=jax.ShapeDtypeStruct((tokens_p, feat_p), out_dtype),
        grid_spec=pltpu.PrefetchScalarGridSpec(
            num_scalar_prefetch=0,
            grid=grid,
            in_specs=in_specs,
            out_specs=out_specs,
            scratch_shapes=scratch_shapes,
        ),
        compiler_params=pltpu.CompilerParams(
            dimension_semantics=dims,
            vmem_limit_bytes=vmem_limit,
        ),
        cost_estimate=cost,
    )(x2d, w1_p, b1_p, w2_p, b2_p)

    return out2d[:tokens, :feat].reshape(orig_shape)


def init_params(key, feat_dim, hidden_dim, dtype=jnp.float32):
    """Kaiming-normal (fan_in, leaky_relu a=0 -> gain=sqrt(2)) like the module."""
    k1, k2 = jax.random.split(key)
    # torch weight shape is (out, in); we store transposed (in, out) for x @ W.
    std1 = math.sqrt(2.0) / math.sqrt(feat_dim)     # fan_in = feat_dim
    std2 = math.sqrt(2.0) / math.sqrt(hidden_dim)   # fan_in = hidden_dim
    w1 = (jax.random.normal(k1, (feat_dim, hidden_dim)) * std1).astype(dtype)
    w2 = (jax.random.normal(k2, (hidden_dim, feat_dim)) * std2).astype(dtype)
    # torch.nn.Linear default bias init is U(-1/sqrt(fan_in), 1/sqrt(fan_in));
    # zeros kept here for determinism-simplicity (shapes match the module).
    b1 = jnp.zeros((hidden_dim,), dtype)
    b2 = jnp.zeros((feat_dim,), dtype)
    return w1, b1, w2, b2


if __name__ == "__main__":
    batch, seq, feat_dim, hidden_dim = 2, 8, 32, 256

    key = jax.random.PRNGKey(0)
    kx, kp = jax.random.split(key)
    x = jax.random.normal(kx, (batch, seq, feat_dim), dtype=jnp.float32)
    w1, b1, w2, b2 = init_params(kp, feat_dim, hidden_dim)

    # Pure-JAX reference (exact-erf GELU, dropout in eval mode).
    h_ref = x.reshape(-1, feat_dim) @ w1 + b1
    h_ref = 0.5 * h_ref * (1.0 + jax.lax.erf(h_ref / math.sqrt(2.0)))
    y_ref = (h_ref @ w2 + b2).reshape(batch, seq, feat_dim)

    # 1) Auto tiling -> weight-resident single-k-step path.
    out = jax.block_until_ready(feed_forward_network(x, w1, b1, w2, b2))
    assert out.shape == x.shape
    assert jnp.allclose(out, y_ref, atol=1e-5, rtol=1e-5), "mismatch (resident path)"

    # 2) Forced k-split with f32 output -> accumulate directly in the output block.
    out2 = jax.block_until_ready(
        feed_forward_network(x, w1, b1, w2, b2, tile_m=8, tile_k=128))
    assert jnp.allclose(out2, y_ref, atol=1e-5, rtol=1e-5), "mismatch (inplace k-split)"

    # 3) bf16 inputs with forced k-split -> f32 VMEM scratch accumulator path.
    out3 = jax.block_until_ready(
        feed_forward_network(x.astype(jnp.bfloat16),
                             w1.astype(jnp.bfloat16), b1.astype(jnp.bfloat16),
                             w2.astype(jnp.bfloat16), b2.astype(jnp.bfloat16),
                             tile_m=16, tile_k=128))
    assert out3.dtype == jnp.bfloat16
    assert jnp.allclose(out3.astype(jnp.float32), y_ref, atol=1e-1, rtol=1e-1), \
        "mismatch (bf16 scratch k-split)"

    print("KERNEL_OK")
</pallas_src>

<mosaic_0001>
module attributes {stable_mosaic.version = 11 : i64} {
  func.func @_ffn_kernel_resident(%arg0: i32, %arg1: memref<16x128xf32, #tpu.memory_space<vmem>>, %arg2: memref<128x256xf32, #tpu.memory_space<vmem>>, %arg3: memref<1x256xf32, #tpu.memory_space<vmem>>, %arg4: memref<256x128xf32, #tpu.memory_space<vmem>>, %arg5: memref<1x128xf32, #tpu.memory_space<vmem>>, %arg6: memref<16x128xf32, #tpu.memory_space<vmem>>) attributes {dimension_semantics = [#tpu.dimension_semantics<parallel>], iteration_bounds = array<i64: 1>, scalar_prefetch = 0 : i64, scratch_operands = 0 : i64, tpu.core_type = #tpu.core_type<tc>, window_params = [{transform_indices = @transform_0, window_bounds = array<i64: 16, 128>}, {pipeline_mode = #tpu.pipeline_mode<synchronous>, transform_indices = @transform_1, window_bounds = array<i64: 128, 256>}, {pipeline_mode = #tpu.pipeline_mode<synchronous>, transform_indices = @transform_2, window_bounds = array<i64: 1, 256>}, {pipeline_mode = #tpu.pipeline_mode<synchronous>, transform_indices = @transform_3, window_bounds = array<i64: 256, 128>}, {pipeline_mode = #tpu.pipeline_mode<synchronous>, transform_indices = @transform_4, window_bounds = array<i64: 1, 128>}, {transform_indices = @transform_5, window_bounds = array<i64: 16, 128>}]} {
    %c0 = arith.constant 0 : index
    %c0_0 = arith.constant 0 : index
    %0 = vector.load %arg1[%c0, %c0_0] : memref<16x128xf32, #tpu.memory_space<vmem>>, vector<16x128xf32>
    %c0_1 = arith.constant 0 : index
    %c0_2 = arith.constant 0 : index
    %1 = vector.load %arg2[%c0_1, %c0_2] : memref<128x256xf32, #tpu.memory_space<vmem>>, vector<128x256xf32>
    %cst = arith.constant dense<0.000000e+00> : vector<16x256xf32>
    %2 = tpu.matmul %0, %1, %cst {dimension_numbers = #tpu.dot_dimension_numbers<[1], [0], [0], [1], [0, 0, 1, 1], [], []>} : vector<16x128xf32>, vector<128x256xf32>, vector<16x256xf32> -> vector<16x256xf32>
    %c0_3 = arith.constant 0 : index
    %c0_4 = arith.constant 0 : index
    %3 = vector.load %arg3[%c0_3, %c0_4] : memref<1x256xf32, #tpu.memory_space<vmem>>, vector<1x256xf32>
    %4 = vector.broadcast %3 : vector<1x256xf32> to vector<16x256xf32>
    %5 = arith.addf %2, %4 : vector<16x256xf32>
    %cst_5 = arith.constant 5.000000e-01 : f32
    %6 = vector.broadcast %cst_5 : f32 to vector<16x256xf32>
    %7 = arith.mulf %6, %5 : vector<16x256xf32>
    %cst_6 = arith.constant 0.707106769 : f32
    %8 = vector.broadcast %cst_6 : f32 to vector<16x256xf32>
    %9 = arith.mulf %5, %8 : vector<16x256xf32>
    %10 = math.erf %9 : vector<16x256xf32>
    %cst_7 = arith.constant 1.000000e+00 : f32
    %11 = vector.broadcast %cst_7 : f32 to vector<16x256xf32>
    %12 = arith.addf %11, %10 : vector<16x256xf32>
    %13 = arith.mulf %7, %12 : vector<16x256xf32>
    %c0_8 = arith.constant 0 : index
    %c0_9 = arith.constant 0 : index
    %14 = vector.load %arg4[%c0_8, %c0_9] : memref<256x128xf32, #tpu.memory_space<vmem>>, vector<256x128xf32>
    %cst_10 = arith.constant dense<0.000000e+00> : vector<16x128xf32>
    %15 = tpu.matmul %13, %14, %cst_10 {dimension_numbers = #tpu.dot_dimension_numbers<[1], [0], [0], [1], [0, 0, 1, 1], [], []>} : vector<16x256xf32>, vector<256x128xf32>, vector<16x128xf32> -> vector<16x128xf32>
    %c0_11 = arith.constant 0 : index
    %c0_12 = arith.constant 0 : index
    %16 = vector.load %arg5[%c0_11, %c0_12] : memref<1x128xf32, #tpu.memory_space<vmem>>, vector<1x128xf32>
    %17 = vector.broadcast %16 : vector<1x128xf32> to vector<16x128xf32>
    %18 = arith.addf %15, %17 : vector<16x128xf32>
    %c0_13 = arith.constant 0 : index
    %c0_14 = arith.constant 0 : index
    %19 = vector.load %arg6[%c0_13, %c0_14] : memref<16x128xf32, #tpu.memory_space<vmem>>, vector<16x128xf32>
    tpu.vector_store %arg6[%c0_13, %c0_14], %18 {strides = array<i32>} : memref<16x128xf32, #tpu.memory_space<vmem>>, vector<16x128xf32>,
    return
  }
  func.func @transform_0(%arg0: i32) -> (i32, i32) {
    %c0_i32 = arith.constant 0 : i32
    %c0_i32_0 = arith.constant 0 : i32
    return %arg0, %c0_i32 : i32, i32
  }
  func.func @transform_1(%arg0: i32) -> (i32, i32) {
    %c0_i32 = arith.constant 0 : i32
    %c0_i32_0 = arith.constant 0 : i32
    %c0_i32_1 = arith.constant 0 : i32
    return %c0_i32, %c0_i32_0 : i32, i32
  }
  func.func @transform_2(%arg0: i32) -> (i32, i32) {
    %c0_i32 = arith.constant 0 : i32
    %c0_i32_0 = arith.constant 0 : i32
    %c0_i32_1 = arith.constant 0 : i32
    return %c0_i32, %c0_i32_0 : i32, i32
  }
  func.func @transform_3(%arg0: i32) -> (i32, i32) {
    %c0_i32 = arith.constant 0 : i32
    %c0_i32_0 = arith.constant 0 : i32
    %c0_i32_1 = arith.constant 0 : i32
    return %c0_i32, %c0_i32_0 : i32, i32
  }
  func.func @transform_4(%arg0: i32) -> (i32, i32) {
    %c0_i32 = arith.constant 0 : i32
    %c0_i32_0 = arith.constant 0 : i32
    %c0_i32_1 = arith.constant 0 : i32
    return %c0_i32, %c0_i32_0 : i32, i32
  }
  func.func @transform_5(%arg0: i32) -> (i32, i32) {
    %c0_i32 = arith.constant 0 : i32
    %c0_i32_0 = arith.constant 0 : i32
    return %arg0, %c0_i32 : i32, i32
  }
}

</mosaic_0001>

<bundles_post_ra>
// kernel: tpu_custom_call.1
= control target key start
LH: loop header
LB: loop body
LE: loop exit
PB: predicated region body
PF: predicated region fallthrough
CT: control target
= control target key end

     0   :  { %10 = vsyncpa [#allocation3], 0  ;;  %s763_s0 = inlined_call_operand.hbm [shape: f32[16,128], index: 0, kind: input, shape index: {}]   ;;  %s764_s1 = inlined_call_operand.hbm [shape: f32[128,256], index: 1, kind: input, shape index: {}]   ;;  %s765_s2 = inlined_call_operand.hbm [shape: f32[1,256], index: 2, kind: input, shape index: {}]   ;;  %s766_s3 = inlined_call_operand.hbm [shape: f32[256,128], index: 3, kind: input, shape index: {}]   ;;  %s767_s4 = inlined_call_operand.vmem [shape: f32[1,128], index: 4, kind: input, shape index: {}]   ;;  %s768_s5 = inlined_call_operand.hbm [shape: f32[16,128], index: 5, kind: output, shape index: {}]  }
   0x1   :  { %11 = vsyncpa [#allocation6], 0 }
   0x2   :  { %12 = vsyncpa [#allocation9], 0  ;;  %s31_s20 = sshll.u32 %s764_s1, 4  ;;  %s32_s20 = int_to_ptr.hbm [resolvable:$true] %s31_s20 }
   0x3   :  { %13 = vsyncpa [#allocation4], 0  ;;  %s599_s21 = smov [#allocation5]   ;;  %s18_s25 = sshll.u32 %s763_s0, 4  ;;  %s19_s25 = int_to_ptr.hbm [resolvable:$true] %s18_s25 }
   0x4   :  { %s33_s22 = sshll.u32 %s599_s21, 4  ;;  %s600_s26 = smov 256   ;;  %s34_s22 = int_to_ptr.vmem [resolvable:$true] %s33_s22 }
   0x5   :  { %s601_s27 = smov 16   ;;  %s602_s28 = smov [#allocation2]  }
   0x6   :  { %39 = dma.hbm_to_vmem [thread:$0]  %s32_s20, 4096, %s34_s22, [#allocation6], %s600_s26, %s600_s26, %s601_s27  }
   0x7   :  { %s20_s29 = sshll.u32 %s602_s28, 4  ;;  %s603_s30 = smov 128   ;;  %s21_s29 = int_to_ptr.vmem [resolvable:$true] %s20_s29 }
   0x8   :  { %s604_s6 = smov 8   ;;  %s45_s8 = sshll.u32 %s765_s2, 4  ;;  %s46_s8 = int_to_ptr.hbm [resolvable:$true] %s45_s8 }
   0x9   :  { %26 = dma.hbm_to_vmem [thread:$0]  %s19_s25, 256, %s21_s29, [#allocation3], %s603_s30, %s603_s30, %s604_s6  }
   0xa   :  { %s605_s9 = smov [#allocation7]   ;;  %s55_s12 = sshll.u32 %s766_s3, 4  ;;  %s56_s12 = int_to_ptr.hbm [resolvable:$true] %s55_s12 }
   0xb   :  { %s47_s0 = sshll.u32 %s605_s9, 4  ;;  %s606_s13 = smov [#allocation8]   ;;  %s48_s0 = int_to_ptr.vmem [resolvable:$true] %s47_s0 }
   0xc   :  { %50 = dma.hbm_to_vmem [thread:$0]  %s46_s8, 32, %s48_s0, [#allocation6]  }
   0xd   :  { %s57_s14 = sshll.u32 %s606_s13, 4  ;;  %s58_s14 = int_to_ptr.vmem [resolvable:$true] %s57_s14 }
   0xe   :  { %63 = dma.hbm_to_vmem [thread:$0]  %s56_s12, 4096, %s58_s14, [#allocation9], %s603_s30, %s603_s30, %s604_s6  }
   0xf   :  { %591 = dma.done.wait [#allocation3], 256  }
  0x10   :  { %592 = vsyncadd [#allocation3], 4294967040 }
  0x11   :  { %593 = dma.done.wait [#allocation6], 4128  }
  0x12   :  { %594 = vsyncadd [#allocation6], 4294963168 }
  0x13   :  { %595 = dma.done.wait [#allocation9], 4096  }
  0x14   :  { %596 = vsyncadd [#allocation9], 4294963200  ;;  %v114_v0 = vld [vmem:[#allocation5 + $0xf0] sm:$0xff]  ;;  %v115_v1 = vld [vmem:[#allocation5 + $0xf8] sm:$0xff]  ;;  %s607_s15 = smov [#allocation10]   ;;  %s434_s19 = sshll.u32 %s768_s5, 4  ;;  %s435_s19 = int_to_ptr.hbm [resolvable:$true] %s434_s19 }
  0x15   :  { %v112_v2 = vld [vmem:[#allocation5 + $0xe0] sm:$0xff]  ;;  %122 = vmatpush.msra.mxu0 %v114_v0  ;;  %145 = vmatpush.msra.mxu1 %v115_v1  ;;  %v113_v3 = vld [vmem:[#allocation5 + $0xe8] sm:$0xff]  ;;  %v110_v4 = vld [vmem:[#allocation5 + $0xd0] sm:$0xff]  ;;  %s432_s16 = sshll.u32 %s607_s15, 4  ;;  %s433_s16 = int_to_ptr.vmem [resolvable:$true] %s432_s16 }
  0x16   :  { %v111_v5 = vld [vmem:[#allocation5 + $0xd8] sm:$0xff]  ;;  %v108_v6 = vld [vmem:[#allocation5 + $0xc0] sm:$0xff]  ;;  %v109_v7 = vld [vmem:[#allocation5 + $0xc8] sm:$0xff] }
  0x17   :  { %123 = vmatpush.msra.mxu0 %v112_v2  ;;  %146 = vmatpush.msra.mxu1 %v113_v3  ;;  %v106_v8 = vld [vmem:[#allocation5 + $0xb0] sm:$0xff]  ;;  %v107_v9 = vld [vmem:[#allocation5 + $0xb8] sm:$0xff]  ;;  %v104_v10 = vld [vmem:[#allocation5 + $0xa0] sm:$0xff] }
  0x18   :  { %v105_v11 = vld [vmem:[#allocation5 + $0xa8] sm:$0xff]  ;;  %v102_v12 = vld [vmem:[#allocation5 + $0x90] sm:$0xff]  ;;  %v103_v13 = vld [vmem:[#allocation5 + $0x98] sm:$0xff] }
  0x19   :  { %124 = vmatpush.msra.mxu0 %v110_v4  ;;  %147 = vmatpush.msra.mxu1 %v111_v5  ;;  %v100_v14 = vld [vmem:[#allocation5 + $0x80] sm:$0xff]  ;;  %v101_v15 = vld [vmem:[#allocation5 + $0x88] sm:$0xff]  ;;  %v98_v16 = vld [vmem:[#allocation5 + $0x70] sm:$0xff] }
  0x1a   :  { %v99_v17 = vld [vmem:[#allocation5 + $0x78] sm:$0xff]  ;;  %v96_v18 = vld [vmem:[#allocation5 + $0x60] sm:$0xff]  ;;  %v97_v19 = vld [vmem:[#allocation5 + $0x68] sm:$0xff] }
  0x1b   :  { %125 = vmatpush.msra.mxu0 %v108_v6  ;;  %148 = vmatpush.msra.mxu1 %v109_v7  ;;  %v94_v20 = vld [vmem:[#allocation5 + $0x50] sm:$0xff]  ;;  %v95_v21 = vld [vmem:[#allocation5 + $0x58] sm:$0xff]  ;;  %v92_v22 = vld [vmem:[#allocation5 + $0x40] sm:$0xff] }
  0x1c   :  { %v93_v23 = vld [vmem:[#allocation5 + $0x48] sm:$0xff]  ;;  %v90_v24 = vld [vmem:[#allocation5 + $0x30] sm:$0xff]  ;;  %v91_v25 = vld [vmem:[#allocation5 + $0x38] sm:$0xff] }
  0x1d   :  { %126 = vmatpush.msra.mxu0 %v106_v8  ;;  %149 = vmatpush.msra.mxu1 %v107_v9  ;;  %v88_v26 = vld [vmem:[#allocation5 + $0x20] sm:$0xff]  ;;  %v89_v27 = vld [vmem:[#allocation5 + $0x28] sm:$0xff]  ;;  %v86_v28 = vld [vmem:[#allocation5 + $0x10] sm:$0xff] }
  0x1e   :  { %v87_v29 = vld [vmem:[#allocation5 + $0x18] sm:$0xff]  ;;  %v84_v30 = vld [vmem:[#allocation5] sm:$0xff]  ;;  %v85_v31 = vld [vmem:[#allocation5 + $0x8] sm:$0xff] }
  0x1f   :  { %127 = vmatpush.msra.mxu0 %v104_v10  ;;  %150 = vmatpush.msra.mxu1 %v105_v11  ;;  %v82_v32 = vld [vmem:[#allocation2] sm:$0xff]  ;;  %v83_v33 = vld [vmem:[#allocation2 + $0x8] sm:$0xff]  ;;  %v116_v38 = vld [vmem:[#allocation7] sm:$0x3] }
  0x20   :  { %v359_v34 = vld [vmem:[#allocation8 + $0x78] sm:$0xff]  ;;  %v358_v36 = vld [vmem:[#allocation8 + $0x70] sm:$0xff]  ;;  %v357_v39 = vld [vmem:[#allocation8 + $0x68] sm:$0xff]  ;;  %v118_v41 = vperm.slane %v116_v38, 0  ;;  %v119_v42 = vperm.slane %v116_v38, 1 }
  0x21   :  { %128 = vmatpush.msra.mxu0 %v102_v12  ;;  %151 = vmatpush.msra.mxu1 %v103_v13  ;;  %v375_v35 = vld [vmem:[#allocation8 + $0xf8] sm:$0xff]  ;;  %v374_v37 = vld [vmem:[#allocation8 + $0xf0] sm:$0xff]  ;;  %v373_v40 = vld [vmem:[#allocation8 + $0xe8] sm:$0xff] }
  0x22   :  { %380 = vmatpush.msra.mxu2 %v359_v34  ;;  %403 = vmatpush.msra.mxu3 %v375_v35  ;;  %v356_v43 = vld [vmem:[#allocation8 + $0x60] sm:$0xff]  ;;  %v355_v45 = vld [vmem:[#allocation8 + $0x58] sm:$0xff]  ;;  %v354_v51 = vld [vmem:[#allocation8 + $0x50] sm:$0xff] }
  0x23   :  { %129 = vmatpush.msra.mxu0 %v100_v14  ;;  %152 = vmatpush.msra.mxu1 %v101_v15  ;;  %v372_v44 = vld [vmem:[#allocation8 + $0xe0] sm:$0xff]  ;;  %v371_v46 = vld [vmem:[#allocation8 + $0xd8] sm:$0xff]  ;;  %v370_v52 = vld [vmem:[#allocation8 + $0xd0] sm:$0xff] }
  0x24   :  { %381 = vmatpush.msra.mxu2 %v358_v36  ;;  %404 = vmatpush.msra.mxu3 %v374_v37  ;;  %v353_v55 = vld [vmem:[#allocation8 + $0x48] sm:$0xff]  ;;  %v352_v59 = vld [vmem:[#allocation8 + $0x40] sm:$0xff]  ;;  %v351_v61 = vld [vmem:[#allocation8 + $0x38] sm:$0xff] }
  0x25   :  { %130 = vmatpush.msra.mxu0 %v98_v16  ;;  %153 = vmatpush.msra.mxu1 %v99_v17  ;;  %v369_v56 = vld [vmem:[#allocation8 + $0xc8] sm:$0xff]  ;;  %v368_v60 = vld [vmem:[#allocation8 + $0xc0] sm:$0xff]  ;;  %v367_v62 = vld [vmem:[#allocation8 + $0xb8] sm:$0xff] }
  0x26   :  { %382 = vmatpush.msra.mxu2 %v357_v39  ;;  %405 = vmatpush.msra.mxu3 %v373_v40  ;;  %v350_v3 = vld [vmem:[#allocation8 + $0x30] sm:$0xff]  ;;  %v349_v9 = vld [vmem:[#allocation8 + $0x28] sm:$0xff]  ;;  %v348_v16 = vld [vmem:[#allocation8 + $0x20] sm:$0xff] }
  0x27   :  { %131 = vmatpush.msra.mxu0 %v96_v18  ;;  %154 = vmatpush.msra.mxu1 %v97_v19  ;;  %v366_v4 = vld [vmem:[#allocation8 + $0xb0] sm:$0xff]  ;;  %v365_v10 = vld [vmem:[#allocation8 + $0xa8] sm:$0xff]  ;;  %v364_v17 = vld [vmem:[#allocation8 + $0xa0] sm:$0xff] }
  0x28   :  { %383 = vmatpush.msra.mxu2 %v356_v43  ;;  %406 = vmatpush.msra.mxu3 %v372_v44  ;;  %v345_v38 = vld [vmem:[#allocation8 + $0x8] sm:$0xff] }
  0x29   :  { %132 = vmatpush.msra.mxu0 %v94_v20  ;;  %155 = vmatpush.msra.mxu1 %v95_v21  ;;  %v361_v39 = vld [vmem:[#allocation8 + $0x88] sm:$0xff] }
  0x2a   :  { %384 = vmatpush.msra.mxu2 %v355_v45  ;;  %407 = vmatpush.msra.mxu3 %v371_v46  ;;  %v344_v46 = vld [vmem:[#allocation8] sm:$0xff] }
  0x2b   :  { %133 = vmatpush.msra.mxu0 %v92_v22  ;;  %156 = vmatpush.msra.mxu1 %v93_v23 }
  0x2c   :  { %385 = vmatpush.msra.mxu2 %v354_v51  ;;  %408 = vmatpush.msra.mxu3 %v370_v52 }
  0x2d   :  { %134 = vmatpush.msra.mxu0 %v90_v24  ;;  %157 = vmatpush.msra.mxu1 %v91_v25  ;;  %v347_v24 = vld [vmem:[#allocation8 + $0x18] sm:$0xff] }
  0x2e   :  { %386 = vmatpush.msra.mxu2 %v353_v55  ;;  %409 = vmatpush.msra.mxu3 %v369_v56  ;;  %v363_v25 = vld [vmem:[#allocation8 + $0x98] sm:$0xff] }
  0x2f   :  { %135 = vmatpush.msra.mxu0 %v88_v26  ;;  %158 = vmatpush.msra.mxu1 %v89_v27 }
  0x30   :  { %387 = vmatpush.msra.mxu2 %v352_v59  ;;  %410 = vmatpush.msra.mxu3 %v368_v60 }
  0x31   :  { %136 = vmatpush.msra.mxu0 %v86_v28  ;;  %159 = vmatpush.msra.mxu1 %v87_v29 }
  0x32   :  { %388 = vmatpush.msra.mxu2 %v351_v61  ;;  %411 = vmatpush.msra.mxu3 %v367_v62 }
  0x33   :  { %137 = vmatpush.msra.mxu0 %v84_v30  ;;  %160 = vmatpush.msra.mxu1 %v85_v31 }
  0x34   :  { %138 = vmatmul.f32.vlgmr.msra.gmra.mxu0 %v82_v32  ;;  %161 = vmatmul.f32.vlgmr.msra.gmra.mxu1 %v82_v32  ;;  %v346_v32 = vld [vmem:[#allocation8 + $0x10] sm:$0xff] }
  0x35   :  { %389 = vmatpush.msra.mxu2 %v350_v3  ;;  %412 = vmatpush.msra.mxu3 %v366_v4 }
  0x37   :  { %390 = vmatpush.msra.mxu2 %v349_v9  ;;  %413 = vmatpush.msra.mxu3 %v365_v10 }
  0x39   :  { %391 = vmatpush.msra.mxu2 %v348_v16  ;;  %414 = vmatpush.msra.mxu3 %v364_v17 }
  0x3b   :  { %392 = vmatpush.msra.mxu2 %v347_v24  ;;  %415 = vmatpush.msra.mxu3 %v363_v25 }
  0x3c   :  { %141 = vmatmul.f32.gmra.mxu0 %v83_v33  ;;  %164 = vmatmul.f32.gmra.mxu1 %v83_v33  ;;  %v362_v33 = vld [vmem:[#allocation8 + $0x90] sm:$0xff] }
  0x3d   :  { %393 = vmatpush.msra.mxu2 %v346_v32  ;;  %416 = vmatpush.msra.mxu3 %v362_v33 }
  0x3f   :  { %394 = vmatpush.msra.mxu2 %v345_v38  ;;  %417 = vmatpush.msra.mxu3 %v361_v39 }
  0x41   :  { %395 = vmatpush.msra.mxu2 %v344_v46 }
  0xb1   :  { %v139_v47 = vpop.f32.mrf.mxu0  ;;  %v162_v48 = vpop.f32.mrf.mxu1 }
  0xb2   :  { %v656_v49 = vadd.f32 %v139_v47, %v118_v41  ;;  %v658_v50 = vadd.f32 %v162_v48, %v119_v42  ;;  %v360_v47 = vld [vmem:[#allocation8 + $0x80] sm:$0xff] }
  0xb3   :  { %418 = vmatpush.msra.mxu3 %v360_v47 }
  0xb4   :  { %v661_v53 = vmul.f32 0.70710677, %v656_v49  ;;  %v664_v54 = vmul.f32 0.70710677, %v658_v50 }
  0xb6   :  { %v176_v57 = vmul.f32 %v661_v53, %v661_v53  ;;  %v216_v58 = vmul.f32 %v664_v54, %v664_v54 }
  0xb8   :  { %v670_v63 = vmin.f32 %v176_v57, 16.0  ;;  %v672_v0 = vmin.f32 %v216_v58, 16.0 }
  0xb9   :  { %v142_v1 = vpop.f32.mrf.mxu0  ;;  %v165_v2 = vpop.f32.mrf.mxu1 }
  0xba   :  { %v178_v5 = vmul.f32 2.1237322e-06, %v670_v63  ;;  %v218_v6 = vmul.f32 2.1237322e-06, %v672_v0  ;;  %v676_v7 = vadd.f32 %v142_v1, %v118_v41  ;;  %v678_v8 = vadd.f32 %v165_v2, %v119_v42 }
  0xbb   :  { %v189_v11 = vmul.f32 3.8918573e-05, %v670_v63  ;;  %v229_v21 = vmul.f32 3.8918573e-05, %v672_v0 }
  0xbc   :  { %v179_v12 = vadd.f32 0.00028619796, %v178_v5  ;;  %v219_v13 = vadd.f32 0.00028619796, %v218_v6  ;;  %v682_v14 = vmul.f32 0.70710677, %v676_v7 }
  0xbd   :  { %v685_v15 = vmul.f32 0.70710677, %v678_v8  ;;  %v190_v20 = vadd.f32 0.001143296, %v189_v11  ;;  %v230_v29 = vadd.f32 0.001143296, %v229_v21 }
  0xbe   :  { %v180_v18 = vmul.f32 %v179_v12, %v670_v63  ;;  %v220_v19 = vmul.f32 %v219_v13, %v672_v0  ;;  %v256_v22 = vmul.f32 %v682_v14, %v682_v14 }
  0xbf   :  { %v296_v23 = vmul.f32 %v685_v15, %v685_v15  ;;  %v191_v28 = vmul.f32 %v190_v20, %v670_v63  ;;  %v231_v36 = vmul.f32 %v230_v29, %v672_v0 }
  0xc0   :  { %v181_v26 = vadd.f32 0.0036580483, %v180_v18  ;;  %v221_v27 = vadd.f32 0.0036580483, %v220_v19  ;;  %v695_v30 = vmin.f32 %v256_v22, 16.0 }
  0xc1   :  { %v697_v31 = vmin.f32 %v296_v23, 16.0  ;;  %v192_v35 = vadd.f32 0.014752088, %v191_v28  ;;  %v232_v44 = vadd.f32 0.014752088, %v231_v36 }
  0xc2   :  { %v182_v34 = vmul.f32 %v181_v26, %v670_v63  ;;  %v258_v37 = vmul.f32 2.1237322e-06, %v695_v30  ;;  %v269_v40 = vmul.f32 3.8918573e-05, %v695_v30  ;;  %v222_v41 = vmul.f32 %v221_v27, %v672_v0 }
  0xc3   :  { %v298_v42 = vmul.f32 2.1237322e-06, %v697_v31  ;;  %v193_v43 = vmul.f32 %v192_v35, %v670_v63  ;;  %v233_v55 = vmul.f32 %v232_v44, %v672_v0  ;;  %v309_v58 = vmul.f32 3.8918573e-05, %v697_v31 }
  0xc4   :  { %v259_v45 = vadd.f32 0.00028619796, %v258_v37  ;;  %v270_v48 = vadd.f32 0.001143296, %v269_v40  ;;  %v183_v51 = vadd.f32 0.05243302, %v182_v34 }
  0xc5   :  { %v194_v52 = vadd.f32 0.112945676, %v193_v43  ;;  %v223_v59 = vadd.f32 0.05243302, %v222_v41  ;;  %v299_v60 = vadd.f32 0.00028619796, %v298_v42 }
  0xc6   :  { %v260_v56 = vmul.f32 %v259_v45, %v695_v30  ;;  %v271_v57 = vmul.f32 %v270_v48, %v695_v30  ;;  %v234_v62 = vadd.f32 0.112945676, %v233_v55  ;;  %v184_v3 = vmul.f32 %v183_v51, %v670_v63 }
  0xc7   :  { %v195_v61 = vmul.f32 %v194_v52, %v670_v63  ;;  %v310_v9 = vadd.f32 0.001143296, %v309_v58  ;;  %v224_v10 = vmul.f32 %v223_v59, %v672_v0  ;;  %v300_v11 = vmul.f32 %v299_v60, %v697_v31 }
  0xc8   :  { %v261_v1 = vadd.f32 0.0036580483, %v260_v56  ;;  %v272_v2 = vadd.f32 0.014752088, %v271_v57  ;;  %v235_v5 = vmul.f32 %v234_v62, %v672_v0  ;;  %v185_v19 = vadd.f32 0.18741608, %v184_v3 }
  0xc9   :  { %v196_v4 = vadd.f32 0.4994258, %v195_v61  ;;  %v311_v18 = vmul.f32 %v310_v9, %v697_v31  ;;  %v225_v24 = vadd.f32 0.18741608, %v224_v10  ;;  %v301_v25 = vadd.f32 0.0036580483, %v300_v11 }
  0xca   :  { %v273_v6 = vmul.f32 %v272_v2, %v695_v30  ;;  %v236_v13 = vadd.f32 0.4994258, %v235_v5  ;;  %v262_v16 = vmul.f32 %v261_v1, %v695_v30  ;;  %v186_v29 = vmul.f32 %v185_v19, %v670_v63 }
  0xcb   :  { %v197_v12 = vmul.f32 %v196_v4, %v670_v63  ;;  %v312_v23 = vadd.f32 0.014752088, %v311_v18  ;;  %v226_v33 = vmul.f32 %v225_v24, %v672_v0  ;;  %v302_v34 = vmul.f32 %v301_v25, %v697_v31 }
  0xcc   :  { %v274_v17 = vadd.f32 0.112945676, %v273_v6  ;;  %v237_v21 = vmul.f32 %v236_v13, %v672_v0  ;;  %v263_v26 = vadd.f32 0.05243302, %v262_v16  ;;  %v187_v39 = vadd.f32 1.1283791, %v186_v29 }
  0xcd   :  { %v198_v20 = vadd.f32 1.0, %v197_v12  ;;  %v313_v28 = vmul.f32 %v312_v23, %v697_v31  ;;  %v227_v43 = vadd.f32 1.1283791, %v226_v33  ;;  %v303_v63 = vadd.f32 0.05243302, %v302_v34 }
  0xce   :  { %v275_v22 = vmul.f32 %v274_v17, %v695_v30  ;;  %v238_v27 = vadd.f32 1.0, %v237_v21  ;;  %v264_v37 = vmul.f32 %v263_v26, %v695_v30  ;;  %v188_v47 = vmul.f32 %v187_v39, %v661_v53 }
  0xcf   :  { %463 = vrcp.f32 %v198_v20  ;;  %v314_v36 = vadd.f32 0.112945676, %v313_v28  ;;  %v210_v48 = vand.u32 2147483648, %v198_v20  ;;  %v208_v55 = vand.u32 2147483647, %v198_v20 }
  0xd0   :  { %v276_v32 = vadd.f32 0.4994258, %v275_v22  ;;  %465 = vrcp.f32 %v238_v27  ;;  %v265_v0 = vadd.f32 0.18741608, %v264_v37  ;;  %v228_v57 = vmul.f32 %v227_v43, %v664_v54 }
  0xd1   :  { %v315_v41 = vmul.f32 %v314_v36, %v697_v31  ;;  %v304_v58 = vmul.f32 %v303_v63, %v697_v31  ;;  %vm204_vm1 = vweird.f32 %v198_v20  ;;  %v250_v62 = vand.u32 2147483648, %v238_v27 }
  0xd2   :  { %v277_v35 = vmul.f32 %v276_v32, %v695_v30  ;;  %v266_v60 = vmul.f32 %v265_v0, %v695_v30  ;;  %v211_v2 = vor.u32 1.1754944e-38, %v210_v48  ;;  %v248_v4 = vand.u32 2147483647, %v238_v27 }
  0xd3   :  { %v316_v46 = vadd.f32 0.4994258, %v315_v41  ;;  %vm209_vm4 = vcmp.eq.f32.partialorder %v208_v55, 8.507059e+37  ;;  %v305_v6 = vadd.f32 0.18741608, %v304_v58  ;;  %vm244_vm5 = vweird.f32 %v238_v27 }
  0xd4   :  { %v727_v40 = vadd.f32 1.0, %v277_v35  ;;  %v267_v30 = vadd.f32 1.1283791, %v266_v60  ;;  %v251_v12 = vor.u32 1.1754944e-38, %v250_v62  ;;  %vm249_vm7 = vcmp.eq.f32.partialorder %v248_v4, 8.507059e+37 }
  0xd5   :  { %v464_v38 = vpop.eup %463  ;;  %v317_v56 = vmul.f32 %v316_v46, %v697_v31  ;;  %v168_v22 = vmul.f32 0.5, %v656_v49  ;;  %v306_v25 = vmul.f32 %v305_v6, %v697_v31  ;;  %v169_v49 = vmul.f32 0.5, %v658_v50 }
  0xd6   :  { %v200_v42 = vmul.f32 %v464_v38, %v198_v20  ;;  %467 = vrcp.f32 %v727_v40  ;;  %v466_v44 = vpop.eup %465  ;;  %vm205_vm0 = vweird.f32 %v464_v38  ;;  %v288_v17 = vand.u32 2147483647, %v727_v40 }
  0xd7   :  { %v240_v51 = vmul.f32 %v466_v44, %v238_v27  ;;  %v736_v1 = vadd.f32 1.0, %v317_v56  ;;  %vm206_vm2 = vmor %vm204_vm1, %vm205_vm0  ;;  %vm245_vm3 = vweird.f32 %v466_v44  ;;  %v290_v18 = vand.u32 2147483648, %v727_v40 }
  0xd8   :  { %v201_v45 = vsub.f32 1.0, %v200_v42  ;;  %vm246_vm6 = vmor %vm244_vm5, %vm245_vm3  ;;  %vm284_vm9 = vweird.f32 %v727_v40  ;;  %v268_v33 = vmul.f32 %v267_v30, %v682_v14  ;;  %vm289_vm11 = vcmp.eq.f32.partialorder %v288_v17, 8.507059e+37 }
  0xd9   :  { %v241_v59 = vsub.f32 1.0, %v240_v51  ;;  %469 = vrcp.f32 %v736_v1  ;;  %v291_v29 = vor.u32 1.1754944e-38, %v290_v18  ;;  %v307_v31 = vadd.f32 1.1283791, %v306_v25 }
  0xda   :  { %v202_v52 = vmul.f32 %v464_v38, %v201_v45  ;;  %v328_v43 = vand.u32 2147483647, %v736_v1  ;;  %vm324_vm13 = vweird.f32 %v736_v1  ;;  %v170_v50 = vmul.f32 0.5, %v676_v7  ;;  %v462_v7 = vld [vmem:[%s767_s4] ss:$0 sm:$0xff] }
  0xdb   :  { %v242_v3 = vmul.f32 %v466_v44, %v241_v59  ;;  %v308_v45 = vmul.f32 %v307_v31, %v685_v15  ;;  %v171_v55 = vmul.f32 0.5, %v678_v8 }
  0xdc   :  { %v203_v61 = vadd.f32 %v464_v38, %v202_v52  ;;  %v468_v53 = vpop.eup %467  ;;  %vm329_vm15 = vcmp.eq.f32.partialorder %v328_v43, 8.507059e+37 }
  0xdd   :  { %v280_v54 = vmul.f32 %v468_v53, %v727_v40  ;;  %v243_v10 = vadd.f32 %v466_v44, %v242_v3  ;;  %vm285_vm8 = vweird.f32 %v468_v53  ;;  %v330_v40 = vand.u32 2147483648, %v736_v1 }
  0xde   :  { %v207_v5 = vsel %vm206_vm2, %v464_v38, %v203_v61  ;;  %vm286_vm10 = vmor %vm284_vm9, %vm285_vm8 }
  0xdf   :  { %v212_v9 = vsel %vm209_vm4, %v211_v2, %v207_v5  ;;  %v281_v13 = vsub.f32 1.0, %v280_v54  ;;  %v247_v16 = vsel %vm246_vm6, %v466_v44, %v243_v10  ;;  %v470_v24 = vpop.eup %469  ;;  %v331_v0 = vor.u32 1.1754944e-38, %v330_v40 }
  0xe0   :  { %v213_v11 = vmul.f32 %v212_v9, %v188_v47  ;;  %v252_v20 = vsel %vm249_vm7, %v251_v12, %v247_v16  ;;  %v320_v32 = vmul.f32 %v470_v24, %v736_v1  ;;  %vm325_vm12 = vweird.f32 %v470_v24 }
  0xe1   :  { %v282_v21 = vmul.f32 %v468_v53, %v281_v13  ;;  %v253_v23 = vmul.f32 %v252_v20, %v228_v57  ;;  %vm326_vm14 = vmor %vm324_vm13, %vm325_vm12 }
  0xe2   :  { %v449_v19 = vclamps-f32 %v213_v11, 1.0  ;;  %v321_v38 = vsub.f32 1.0, %v320_v32 }
  0xe3   :  { %v283_v27 = vadd.f32 %v468_v53, %v282_v21  ;;  %v450_v28 = vclamps-f32 %v253_v23, 1.0 }
  0xe4   :  { %v336_v26 = vadd.f32 1.0, %v449_v19  ;;  %v322_v42 = vmul.f32 %v470_v24, %v321_v38 }
  0xe5   :  { %v287_v35 = vsel %vm286_vm10, %v468_v53, %v283_v27  ;;  %v337_v36 = vadd.f32 1.0, %v450_v28 }
  0xe6   :  { %v340_v34 = vmul.f32 %v336_v26, %v168_v22  ;;  %v292_v37 = vsel %vm289_vm11, %v291_v29, %v287_v35  ;;  %v323_v14 = vadd.f32 %v470_v24, %v322_v42 }
  0xe7   :  { %v293_v39 = vmul.f32 %v292_v37, %v268_v33  ;;  %v341_v41 = vmul.f32 %v337_v36, %v169_v49 }
  0xe8   :  { %396 = vmatmul.f32.vlgmr.msra.gmra.mxu2 %v340_v34  ;;  %v327_v46 = vsel %vm326_vm14, %v470_v24, %v323_v14 }
  0xe9   :  { %v451_v63 = vclamps-f32 %v293_v39, 1.0  ;;  %419 = vmatmul.f32.vlgmr.msra.gmra.mxu3 %v341_v41  ;;  %v332_v48 = vsel %vm329_vm15, %v331_v0, %v327_v46 }
  0xea   :  { %v333_v51 = vmul.f32 %v332_v48, %v308_v45 }
  0xeb   :  { %v338_v44 = vadd.f32 1.0, %v451_v63 }
  0xec   :  { %v452_v52 = vclamps-f32 %v333_v51, 1.0 }
  0xed   :  { %v342_v47 = vmul.f32 %v338_v44, %v170_v50 }
  0xee   :  { %v339_v56 = vadd.f32 1.0, %v452_v52 }
  0xf0   :  { %399 = vmatmul.f32.gmra.mxu2 %v342_v47  ;;  %v343_v57 = vmul.f32 %v339_v56, %v171_v55 }
  0xf2   :  { %422 = vmatmul.f32.gmra.mxu3 %v343_v57 }
 0x16b   :  { %v397_v58 = vpop.f32.mrf.mxu2 }
 0x16c   :  { %v398_v59 = vadd.f32 %v462_v7, %v397_v58  ;;  %v420_v60 = vpop.f32.mrf.mxu3 }
 0x16e   :  { %v421_v15 = vadd.f32 %v420_v60, %v398_v59 }
 0x170   :  { %426 = vst [vmem:[#allocation10] sm:$0xff] %v421_v15 }
 0x173   :  { %v400_v61 = vpop.f32.mrf.mxu2 }
 0x174   :  { %v401_v62 = vadd.f32 %v462_v7, %v400_v61 }
 0x175   :  { %v423_v8 = vpop.f32.mrf.mxu3 }
 0x176   :  { %v424_v1 = vadd.f32 %v423_v8, %v401_v62 }
 0x178   :  { %427 = vst [vmem:[#allocation10 + $0x8] sm:$0xff] %v424_v1 }
 0x179   :  { %440 = dma.vmem_to_hbm [thread:$0]  %s433_s16, 256, %s435_s19, [#allocation4], %s603_s30, %s603_s30, %s604_s6  }
 0x17a   :  { %597 = dma.done.wait [#allocation4], 256  }
 0x17b   :  { %598 = vsyncadd [#allocation4], 4294967040 }
 0x17c   :  { %445 = vsyncpa [#allocation3], 1 }
 0x17d   :  { %446 = vsyncpa [#allocation6], 1 }
 0x17e   :  { %447 = vsyncpa [#allocation9], 1 }
 0x17f   :  { %448 = vsyncpa [#allocation4], 1 }

</bundles_post_ra>
